<compile_context>
chip_gen: v6e
topology: v6e:2x2x1
jax: 0.10.0
libtpu: 0.0.40
codegen_flags: <defaults>
</compile_context>

<pallas_src>
import jax
import jax.numpy as jnp
from jax import lax
from jax.experimental import pallas as pl
from jax.experimental.pallas import tpu as pltpu


MIN_SIGMA = 1e-4
BN_EPS = 1e-5
LANE = 128      # TPU lane width: lane-dense outputs / padded matmul N
SUBLANE = 8     # f32 sublane group: batch padding granularity


def _encoder_kernel(nrows_ref, x_ref, w1_ref, gamma_ref, beta_ref,
                    w2p_ref, b2p_ref, out_ref):
    n = nrows_ref[0]                                           # real batch rows
    n_f = n.astype(jnp.float32)

    # ---- Linear 1 (fused K=D dot, bf16 operands, f32 accumulate) ----
    # b1 omitted: exactly cancelled by the train-mode BatchNorm mean subtraction.
    x = x_ref[...]
    y1 = jnp.dot(x.astype(jnp.bfloat16), w1_ref[...],
                 preferred_element_type=jnp.float32)           # (B_pad, D) f32

    # ---- BatchNorm1d, training-mode batch stats over the REAL rows only ----
    row = lax.broadcasted_iota(jnp.int32, (y1.shape[0], 1), 0)
    rmask = (row < n).astype(jnp.float32)                      # (B_pad, 1)
    inv_n = 1.0 / n_f
    mean = jnp.sum(y1 * rmask, axis=0, keepdims=True) * inv_n
    cent = (y1 - mean) * rmask
    var = jnp.sum(cent * cent, axis=0, keepdims=True) * inv_n  # biased (PyTorch train)
    scale = gamma_ref[...] * lax.rsqrt(var + BN_EPS)           # folded BN, rsqrt on EUP
    shift = beta_ref[...] - mean * scale
    y1 = jnp.maximum(y1 * scale + shift, 0.0)                  # BN + ReLU

    # ---- Linear 2: N padded to 2*LANE, mu half = lanes [0,128), sigma half = [128,256) ----
    y2 = jnp.dot(y1.astype(jnp.bfloat16), w2p_ref[...],
                 preferred_element_type=jnp.float32)
    y2 = y2 + b2p_ref[...]                                     # (B_pad, 2*LANE) f32

    # ---- Single combined output store: mu lanes pass through, sigma lanes softplus ----
    sp = jnp.logaddexp(0.0, y2) + MIN_SIGMA                    # EUP; extra mu-lane work is free filler
    col = lax.broadcasted_iota(jnp.int32, y2.shape, 1)
    out_ref[...] = jnp.where(col < LANE, y2, sp)               # one contiguous 256-lane store


def init_params(key, D, s_size):
    """Parameters in PyTorch layout: Linear weight is (out_features, in_features)."""
    ks = jax.random.split(key, 4)
    scale1 = 1.0 / jnp.sqrt(D)
    return {
        "w1": jax.random.uniform(ks[0], (D, D), jnp.float32, -scale1, scale1),
        "b1": jax.random.uniform(ks[1], (D,), jnp.float32, -scale1, scale1),
        "gamma": jnp.ones((D,), jnp.float32),
        "beta": jnp.zeros((D,), jnp.float32),
        "w2": jax.random.uniform(ks[2], (2 * s_size, D), jnp.float32, -scale1, scale1),
        "b2": jax.random.uniform(ks[3], (2 * s_size,), jnp.float32, -scale1, scale1),
    }


def prepare_params(params, feat_size, h_size, s_size):
    """One-time layout prep, hoisted out of the forward hot path:
    transpose to (in, out), cast weights to bf16, pad Linear-2 N to 2*LANE.
    b1 is dropped (cancelled exactly by train-mode BatchNorm)."""
    assert s_size <= LANE, "padded-N layout assumes s_size <= 128"
    D = feat_size + h_size

    w1 = jnp.asarray(params["w1"], jnp.float32).T.astype(jnp.bfloat16)   # (D_in, D_out)
    gamma = jnp.asarray(params["gamma"], jnp.float32).reshape(1, D)
    beta = jnp.asarray(params["beta"], jnp.float32).reshape(1, D)

    w2t = jnp.asarray(params["w2"], jnp.float32).T                       # (D, 2*s_size)
    b2 = jnp.asarray(params["b2"], jnp.float32)
    w2p = jnp.zeros((D, 2 * LANE), jnp.float32)
    w2p = w2p.at[:, :s_size].set(w2t[:, :s_size])                        # mu half
    w2p = w2p.at[:, LANE:LANE + s_size].set(w2t[:, s_size:])             # sigma half
    w2p = w2p.astype(jnp.bfloat16)
    b2p = jnp.zeros((1, 2 * LANE), jnp.float32)
    b2p = b2p.at[0, :s_size].set(b2[:s_size])
    b2p = b2p.at[0, LANE:LANE + s_size].set(b2[s_size:])
    return {"w1": w1, "gamma": gamma, "beta": beta, "w2p": w2p, "b2p": b2p}


def simple_encoder_forward(obs, h, prep, s_size):
    """obs: (B, C, H, W) f32, h: (B, h_size) f32. Returns (mu, sigma): (B, s_size)."""
    B = obs.shape[0]
    feats = obs.reshape(B, -1).astype(jnp.float32)
    h = jnp.asarray(h, jnp.float32)
    x = jnp.concatenate([feats, h], axis=-1)          # fused (B, D) input slab
    D = x.shape[-1]

    # Pad batch to a full sublane group; BN stats mask padded rows in-kernel.
    B_pad = max(SUBLANE, pl.cdiv(B, SUBLANE) * SUBLANE)
    if B_pad != B:
        x = jnp.pad(x, ((0, B_pad - B), (0, 0)))

    nrows = jnp.array([B], jnp.int32)                 # runtime batch scalar (SMEM)

    flops = 2 * B_pad * D * D + 2 * B_pad * D * (2 * LANE) + 10 * B_pad * D
    transcendentals = B_pad * 2 * LANE + D            # softplus exp + rsqrt
    bytes_accessed = (4 * (x.size + prep["gamma"].size + prep["beta"].size
                           + prep["b2p"].size + B_pad * 2 * LANE)
                      + 2 * (prep["w1"].size + prep["w2p"].size))

    vmem = pl.BlockSpec(memory_space=pltpu.MemorySpace.VMEM)
    smem = pl.BlockSpec(memory_space=pltpu.MemorySpace.SMEM)
    out = pl.pallas_call(
        _encoder_kernel,
        out_shape=jax.ShapeDtypeStruct((B_pad, 2 * LANE), jnp.float32),
        in_specs=[smem, vmem, vmem, vmem, vmem, vmem, vmem],
        out_specs=vmem,
        cost_estimate=pl.CostEstimate(flops=flops,
                                      transcendentals=transcendentals,
                                      bytes_accessed=bytes_accessed),
    )(nrows, x, prep["w1"], prep["gamma"], prep["beta"], prep["w2p"], prep["b2p"])

    mu = out[:B, :s_size]
    sigma = out[:B, LANE:LANE + s_size]
    return mu, sigma


def _reference_forward(obs, h, params, s_size):
    """Plain-JAX reference matching the PyTorch module (train-mode BN)."""
    B = obs.shape[0]
    inpt = jnp.concatenate([obs.reshape(B, -1), h], axis=-1).astype(jnp.float32)
    y1 = jnp.dot(inpt, params["w1"].T, preferred_element_type=jnp.float32) + params["b1"]
    mean = jnp.mean(y1, axis=0, keepdims=True)
    var = jnp.mean((y1 - mean) ** 2, axis=0, keepdims=True)
    y1 = params["gamma"] * (y1 - mean) * lax.rsqrt(var + BN_EPS) + params["beta"]
    y1 = jnp.maximum(y1, 0.0)
    y2 = jnp.dot(y1, params["w2"].T, preferred_element_type=jnp.float32) + params["b2"]
    mu, sig_raw = y2[:, :s_size], y2[:, s_size:]
    return mu, jnp.logaddexp(0.0, sig_raw) + MIN_SIGMA


if __name__ == "__main__":
    # obs_shape = (C, H, W) = (3, 8, 8), h_size = 64, s_size = 32  ->  D = 256
    B, C, H, W = 2, 3, 8, 8
    h_size, s_size = 64, 32
    D = C * H * W + h_size

    key = jax.random.PRNGKey(0)
    k_obs, k_h, k_par = jax.random.split(key, 3)
    obs = jax.random.normal(k_obs, (B, C, H, W), jnp.float32)
    h = jax.random.normal(k_h, (B, h_size), jnp.float32)

    params = init_params(k_par, D, s_size)                     # PyTorch layout
    prep = prepare_params(params, C * H * W, h_size, s_size)   # one-time layout prep

    mu, sigma = simple_encoder_forward(obs, h, prep, s_size)
    jax.block_until_ready((mu, sigma))

    assert mu.shape == (B, s_size) and sigma.shape == (B, s_size)
    assert bool(jnp.all(sigma > 0.0))
    assert bool(jnp.all(jnp.isfinite(mu))) and bool(jnp.all(jnp.isfinite(sigma)))

    mu_ref, sigma_ref = _reference_forward(obs, h, params, s_size)
    assert bool(jnp.allclose(mu, mu_ref, rtol=5e-2, atol=5e-2))
    assert bool(jnp.allclose(sigma, sigma_ref, rtol=5e-2, atol=5e-2))

    print("KERNEL_OK")
</pallas_src>

<mosaic_0001>
module attributes {stable_mosaic.version = 11 : i64} {
  func.func @_encoder_kernel(%arg0: memref<1xi32, #tpu.memory_space<smem>>, %arg1: memref<8x256xf32, #tpu.memory_space<vmem>>, %arg2: memref<256x256xbf16, #tpu.memory_space<vmem>>, %arg3: memref<1x256xf32, #tpu.memory_space<vmem>>, %arg4: memref<1x256xf32, #tpu.memory_space<vmem>>, %arg5: memref<256x256xbf16, #tpu.memory_space<vmem>>, %arg6: memref<1x256xf32, #tpu.memory_space<vmem>>, %arg7: memref<8x256xf32, #tpu.memory_space<vmem>>) attributes {dimension_semantics = [], scalar_prefetch = 0 : i64, scratch_operands = 0 : i64, tpu.core_type = #tpu.core_type<tc>} {
    %c0 = arith.constant 0 : index
    %0 = memref.load %arg0[%c0] : memref<1xi32, #tpu.memory_space<smem>>
    %1 = arith.sitofp %0 : i32 to f32
    %c0_0 = arith.constant 0 : index
    %c0_1 = arith.constant 0 : index
    %2 = vector.load %arg1[%c0_0, %c0_1] : memref<8x256xf32, #tpu.memory_space<vmem>>, vector<8x256xf32>
    %3 = arith.truncf %2 : vector<8x256xf32> to vector<8x256xbf16>
    %c0_2 = arith.constant 0 : index
    %c0_3 = arith.constant 0 : index
    %4 = vector.load %arg2[%c0_2, %c0_3] : memref<256x256xbf16, #tpu.memory_space<vmem>>, vector<256x256xbf16>
    %cst = arith.constant dense<0.000000e+00> : vector<8x256xf32>
    %5 = tpu.matmul %3, %4, %cst {dimension_numbers = #tpu.dot_dimension_numbers<[1], [0], [0], [1], [0, 0, 1, 1], [], []>} : vector<8x256xbf16>, vector<256x256xbf16>, vector<8x256xf32> -> vector<8x256xf32>
    %6 = tpu.iota {dimensions = array<i32: 0>} : vector<8x1xi32>
    %7 = vector.broadcast %0 : i32 to vector<8x1xi32>
    %8 = arith.cmpi slt, %6, %7 : vector<8x1xi32>
    %9 = arith.extui %8 : vector<8x1xi1> to vector<8x1xi32>
    %10 = arith.sitofp %9 : vector<8x1xi32> to vector<8x1xf32>
    %cst_4 = arith.constant 1.000000e+00 : f32
    %11 = arith.divf %cst_4, %1 : f32
    %12 = vector.broadcast %10 : vector<8x1xf32> to vector<8x256xf32>
    %13 = arith.mulf %5, %12 : vector<8x256xf32>
    %cst_5 = arith.constant dense<0.000000e+00> : vector<256xf32>
    %14 = vector.multi_reduction <add>, %13, %cst_5 [0] : vector<8x256xf32> to vector<256xf32>
    %15 = vector.shape_cast %14 : vector<256xf32> to vector<1x256xf32>
    %16 = vector.broadcast %11 : f32 to vector<1x256xf32>
    %17 = arith.mulf %15, %16 : vector<1x256xf32>
    %18 = vector.broadcast %17 : vector<1x256xf32> to vector<8x256xf32>
    %19 = arith.subf %5, %18 : vector<8x256xf32>
    %20 = vector.broadcast %10 : vector<8x1xf32> to vector<8x256xf32>
    %21 = arith.mulf %19, %20 : vector<8x256xf32>
    %22 = arith.mulf %21, %21 : vector<8x256xf32>
    %cst_6 = arith.constant dense<0.000000e+00> : vector<256xf32>
    %23 = vector.multi_reduction <add>, %22, %cst_6 [0] : vector<8x256xf32> to vector<256xf32>
    %24 = vector.shape_cast %23 : vector<256xf32> to vector<1x256xf32>
    %25 = vector.broadcast %11 : f32 to vector<1x256xf32>
    %26 = arith.mulf %24, %25 : vector<1x256xf32>
    %c0_7 = arith.constant 0 : index
    %c0_8 = arith.constant 0 : index
    %27 = vector.load %arg3[%c0_7, %c0_8] : memref<1x256xf32, #tpu.memory_space<vmem>>, vector<1x256xf32>
    %cst_9 = arith.constant 9.99999974E-6 : f32
    %28 = vector.broadcast %cst_9 : f32 to vector<1x256xf32>
    %29 = arith.addf %26, %28 : vector<1x256xf32>
    %30 = math.rsqrt %29 : vector<1x256xf32>
    %31 = arith.mulf %27, %30 : vector<1x256xf32>
    %c0_10 = arith.constant 0 : index
    %c0_11 = arith.constant 0 : index
    %32 = vector.load %arg4[%c0_10, %c0_11] : memref<1x256xf32, #tpu.memory_space<vmem>>, vector<1x256xf32>
    %33 = arith.mulf %17, %31 : vector<1x256xf32>
    %34 = arith.subf %32, %33 : vector<1x256xf32>
    %35 = vector.broadcast %31 : vector<1x256xf32> to vector<8x256xf32>
    %36 = arith.mulf %5, %35 : vector<8x256xf32>
    %37 = vector.broadcast %34 : vector<1x256xf32> to vector<8x256xf32>
    %38 = arith.addf %36, %37 : vector<8x256xf32>
    %cst_12 = arith.constant 0.000000e+00 : f32
    %39 = vector.broadcast %cst_12 : f32 to vector<8x256xf32>
    %40 = arith.maximumf %38, %39 : vector<8x256xf32>
    %41 = arith.truncf %40 : vector<8x256xf32> to vector<8x256xbf16>
    %c0_13 = arith.constant 0 : index
    %c0_14 = arith.constant 0 : index
    %42 = vector.load %arg5[%c0_13, %c0_14] : memref<256x256xbf16, #tpu.memory_space<vmem>>, vector<256x256xbf16>
    %cst_15 = arith.constant dense<0.000000e+00> : vector<8x256xf32>
    %43 = tpu.matmul %41, %42, %cst_15 {dimension_numbers = #tpu.dot_dimension_numbers<[1], [0], [0], [1], [0, 0, 1, 1], [], []>} : vector<8x256xbf16>, vector<256x256xbf16>, vector<8x256xf32> -> vector<8x256xf32>
    %c0_16 = arith.constant 0 : index
    %c0_17 = arith.constant 0 : index
    %44 = vector.load %arg6[%c0_16, %c0_17] : memref<1x256xf32, #tpu.memory_space<vmem>>, vector<1x256xf32>
    %45 = vector.broadcast %44 : vector<1x256xf32> to vector<8x256xf32>
    %46 = arith.addf %43, %45 : vector<8x256xf32>
    %cst_18 = arith.constant 0.000000e+00 : f32
    %47 = vector.broadcast %cst_18 : f32 to vector<8x256xf32>
    %48 = arith.maximumf %47, %46 : vector<8x256xf32>
    %49 = vector.broadcast %cst_18 : f32 to vector<8x256xf32>
    %50 = arith.subf %49, %46 : vector<8x256xf32>
    %51 = arith.cmpf one, %50, %50 : vector<8x256xf32>
    %52 = vector.broadcast %cst_18 : f32 to vector<8x256xf32>
    %53 = arith.addf %52, %46 : vector<8x256xf32>
    %54 = math.absf %50 : vector<8x256xf32>
    %cst_19 = arith.constant 0.000000e+00 : f32
    %55 = vector.broadcast %cst_19 : f32 to vector<8x256xf32>
    %56 = arith.subf %55, %54 : vector<8x256xf32>
    %57 = math.exp %56 : vector<8x256xf32>
    %58 = math.log1p %57 : vector<8x256xf32>
    %59 = arith.addf %48, %58 : vector<8x256xf32>
    %60 = arith.select %51, %53, %59 : vector<8x256xi1>, vector<8x256xf32>
    %cst_20 = arith.constant 9.99999974E-5 : f32
    %61 = vector.broadcast %cst_20 : f32 to vector<8x256xf32>
    %62 = arith.addf %60, %61 : vector<8x256xf32>
    %63 = tpu.iota {dimensions = array<i32: 1>} : vector<8x256xi32>
    %c128_i32 = arith.constant 128 : i32
    %64 = vector.broadcast %c128_i32 : i32 to vector<8x256xi32>
    %65 = arith.cmpi slt, %63, %64 : vector<8x256xi32>
    %66 = arith.select %65, %46, %62 : vector<8x256xi1>, vector<8x256xf32>
    %c0_21 = arith.constant 0 : index
    %c0_22 = arith.constant 0 : index
    %67 = vector.load %arg7[%c0_21, %c0_22] : memref<8x256xf32, #tpu.memory_space<vmem>>, vector<8x256xf32>
    tpu.vector_store %arg7[%c0_21, %c0_22], %66 {strides = array<i32>} : memref<8x256xf32, #tpu.memory_space<vmem>>, vector<8x256xf32>,
    return
  }
}

</mosaic_0001>

<bundles_post_ra>
// kernel: tpu_custom_call.1
= control target key start
LH: loop header
LB: loop body
LE: loop exit
PB: predicated region body
PF: predicated region fallthrough
CT: control target
= control target key end

     0   :  { %13 = vsyncpa [#allocation4], 0  ;;  %s1090_s0 = inlined_call_operand.<no memory space> [shape: s32[1], index: 0, kind: input, shape index: {}]   ;;  %s1091_s1 = inlined_call_operand.hbm [shape: f32[8,256], index: 1, kind: input, shape index: {}]   ;;  %s1092_s2 = inlined_call_operand.hbm [shape: bf16[256,256], index: 2, kind: input, shape index: {}]   ;;  %s1093_s3 = inlined_call_operand.vmem [shape: f32[1,256], index: 3, kind: input, shape index: {}]   ;;  %s1094_s4 = inlined_call_operand.vmem [shape: f32[1,256], index: 4, kind: input, shape index: {}]   ;;  %s1095_s5 = inlined_call_operand.hbm [shape: bf16[256,256], index: 5, kind: input, shape index: {}]   ;;  %s1096_s6 = inlined_call_operand.vmem [shape: f32[1,256], index: 6, kind: input, shape index: {}]   ;;  %s1097_s7 = inlined_call_operand.hbm [shape: f32[8,256], index: 7, kind: output, shape index: {}]  }
   0x1   :  { %14 = vsyncpa [#allocation7], 0 }
   0x2   :  { %15 = vsyncpa [#allocation5], 0  ;;  %s1005_s24 = smov [#allocation6]  }
   0x3   :  { %s33_s25 = sshll.u32 %s1005_s24, 4  ;;  %s34_s25 = int_to_ptr.vmem [resolvable:$true] %s33_s25 }
   0x4   :  { %s927_s26 = scalar_lea.vmem %s34_s25, 4096  ;;  %p932_p1 = scmp.lt.s32.totalorder %s34_s25, %s34_s25 }
   0x5   :  { %p928_p0 = scmp.ne.s32.totalorder %s34_s25, %s927_s26  ;;  %p933_p2 = scmp.lt.s32.totalorder %s927_s26, %s927_s26 }
   0x7   :  { %p934_p3 = por %p933_p2, %p932_p1 }
   0x9   :  { %p935_p4 = pnand %p934_p3, %p928_p0 }
   0xb   :  { %938 = shalt.err (!%p935_p4)
}
   0xc   :  { %s1006_s27 = smov 128   ;;  %s1007_s28 = smov 8  }
   0xd   :  { %39 = dma.hbm_to_vmem [thread:$0]  %s1092_s2, 4096, %s34_s25, [#allocation7], %s1006_s27, %s1006_s27, %s1007_s28  }
   0xe   :  { %s1008_s8 = smov [#allocation3]   ;;  %s1009_s10 = smov [#allocation8]  }
   0xf   :  { %s24_s9 = sshll.u32 %s1008_s8, 4  ;;  %s49_s11 = sshll.u32 %s1009_s10, 4  ;;  %s25_s9 = int_to_ptr.vmem [resolvable:$true] %s24_s9  ;;  %s50_s11 = int_to_ptr.vmem [resolvable:$true] %s49_s11 }
  0x10   :  { %s947_s12 = scalar_lea.vmem %s25_s9, 256  ;;  %p952_p6 = scmp.lt.s32.totalorder %s25_s9, %s25_s9 }
  0x11   :  { %p948_p5 = scmp.ne.s32.totalorder %s25_s9, %s947_s12  ;;  %p953_p7 = scmp.lt.s32.totalorder %s947_s12, %s947_s12 }
  0x13   :  { %p954_p8 = por %p953_p7, %p952_p6 }
  0x15   :  { %p955_p9 = pnand %p954_p8, %p948_p5 }
  0x17   :  { %958 = shalt.err (!%p955_p9)
}
  0x18   :  { %27 = dma.hbm_to_vmem [thread:$0]  %s1091_s1, 256, %s25_s9, [#allocation4]  }
  0x19   :  { %s967_s15 = scalar_lea.vmem %s50_s11, 4096  ;;  %p972_p11 = scmp.lt.s32.totalorder %s50_s11, %s50_s11 }
  0x1a   :  { %p968_p10 = scmp.ne.s32.totalorder %s50_s11, %s967_s15  ;;  %p973_p12 = scmp.lt.s32.totalorder %s967_s15, %s967_s15 }
  0x1c   :  { %p974_p13 = por %p973_p12, %p972_p11 }
  0x1e   :  { %p975_p0 = pnand %p974_p13, %p968_p10 }
  0x20   :  { %978 = shalt.err (!%p975_p0)
}
  0x21   :  { %55 = dma.hbm_to_vmem [thread:$0]  %s1095_s5, 4096, %s50_s11, [#allocation7], %s1006_s27, %s1006_s27, %s1007_s28  }
  0x22   :  { %999 = dma.done.wait [#allocation4], 256  }
  0x23   :  { %1000 = vsyncadd [#allocation4], 4294967040 }
  0x24   :  { %1001 = dma.done.wait [#allocation7], 8192  }
  0x25   :  { %1002 = vsyncadd [#allocation7], 4294959104  ;;  %s68_s1 = scvt.s32.f32 %s1090_s0  ;;  %v813_v1 = vld [vmem:[#allocation6 + $0x74] ss:$8 sps:$4 sm:$0xff]   ;;  %v815_v2 = vld [vmem:[#allocation6 + $0x70] ss:$8 sps:$4 sm:$0xff]  }
  0x26   :  { %265 = vmatprep.subr.bf16.mxu0 %v813_v1  ;;  %v816_v3 = vld [vmem:[#allocation6 + $0x64] ss:$8 sps:$4 sm:$0xff]   ;;  %v818_v4 = vld [vmem:[#allocation6 + $0x60] ss:$8 sps:$4 sm:$0xff]   ;;  %v819_v5 = vld [vmem:[#allocation6 + $0x54] ss:$8 sps:$4 sm:$0xff]  }
  0x27   :  { %v312_v0 = vstv %s68_s1  ;;  %266 = vmatpush1.bf16.msra.mxu0 %v815_v2  ;;  %v821_v6 = vld [vmem:[#allocation6 + $0x50] ss:$8 sps:$4 sm:$0xff]   ;;  %v822_v7 = vld [vmem:[#allocation6 + $0x44] ss:$8 sps:$4 sm:$0xff]   ;;  %v824_v9 = vld [vmem:[#allocation6 + $0x40] ss:$8 sps:$4 sm:$0xff]  }
  0x28   :  { %909 = vrcp.f32 %v312_v0  ;;  %267 = vmatprep.subr.bf16.mxu0 %v816_v3  ;;  %v825_v10 = vld [vmem:[#allocation6 + $0x34] ss:$8 sps:$4 sm:$0xff]   ;;  %v827_v11 = vld [vmem:[#allocation6 + $0x30] ss:$8 sps:$4 sm:$0xff]   ;;  %v828_v12 = vld [vmem:[#allocation6 + $0x24] ss:$8 sps:$4 sm:$0xff]  }
  0x29   :  { %v830_v13 = vld [vmem:[#allocation6 + $0x20] ss:$8 sps:$4 sm:$0xff]   ;;  %v831_v14 = vld [vmem:[#allocation6 + $0x14] ss:$8 sps:$4 sm:$0xff]   ;;  %v833_v15 = vld [vmem:[#allocation6 + $0x10] ss:$8 sps:$4 sm:$0xff]  }
  0x2a   :  { %v70_v16 = vld [vmem:[#allocation3 + $0x8] sm:$0xff]  ;;  %v834_v17 = vld [vmem:[#allocation6 + $0x4] ss:$8 sps:$4 sm:$0xff]   ;;  %v836_v19 = vld [vmem:[#allocation6] ss:$8 sps:$4 sm:$0xff]  }
  0x2b   :  { %268 = vmatpush1.bf16.msra.mxu0 %v818_v4  ;;  %v72_v18 = vpack.c.bf16 %v70_v16, %v70_v16  ;;  %v837_v20 = vld [vmem:[#allocation6 + $0xf4] ss:$8 sps:$4 sm:$0xff]   ;;  %v839_v21 = vld [vmem:[#allocation6 + $0xf0] ss:$8 sps:$4 sm:$0xff]   ;;  %v840_v22 = vld [vmem:[#allocation6 + $0xe4] ss:$8 sps:$4 sm:$0xff]  }
  0x2c   :  { %269 = vmatprep.subr.bf16.mxu0 %v819_v5  ;;  %v842_v23 = vld [vmem:[#allocation6 + $0xe0] ss:$8 sps:$4 sm:$0xff]   ;;  %v843_v24 = vld [vmem:[#allocation6 + $0xd4] ss:$8 sps:$4 sm:$0xff]   ;;  %v845_v25 = vld [vmem:[#allocation6 + $0xd0] ss:$8 sps:$4 sm:$0xff]  }
  0x2d   :  { %297 = vmatprep.mubr.bf16.mxu0 %v72_v18  ;;  %v846_v26 = vld [vmem:[#allocation6 + $0xc4] ss:$8 sps:$4 sm:$0xff]   ;;  %v848_v27 = vld [vmem:[#allocation6 + $0xc0] ss:$8 sps:$4 sm:$0xff]   ;;  %v849_v28 = vld [vmem:[#allocation6 + $0xb4] ss:$8 sps:$4 sm:$0xff]  }
  0x2e   :  { %v851_v29 = vld [vmem:[#allocation6 + $0xb0] ss:$8 sps:$4 sm:$0xff]   ;;  %v852_v30 = vld [vmem:[#allocation6 + $0xa4] ss:$8 sps:$4 sm:$0xff]   ;;  %v854_v31 = vld [vmem:[#allocation6 + $0xa0] ss:$8 sps:$4 sm:$0xff]  }
  0x2f   :  { %270 = vmatpush1.bf16.msra.mxu0 %v821_v6  ;;  %v855_v32 = vld [vmem:[#allocation6 + $0x94] ss:$8 sps:$4 sm:$0xff]   ;;  %v857_v33 = vld [vmem:[#allocation6 + $0x90] ss:$8 sps:$4 sm:$0xff]   ;;  %v858_v34 = vld [vmem:[#allocation6 + $0x84] ss:$8 sps:$4 sm:$0xff]   ;;  %v306_v6 = vlaneseq }
  0x30   :  { %271 = vmatprep.subr.bf16.mxu0 %v822_v7  ;;  %v860_v35 = vld [vmem:[#allocation6 + $0x80] ss:$8 sps:$4 sm:$0xff]   ;;  %v69_v36 = vld [vmem:[#allocation3] sm:$0xff]  ;;  %v864_v40 = vld [vmem:[#allocation8 + $0x64] ss:$8 sps:$4 sm:$0xff]  }
  0x31   :  { %v71_v37 = vpack.c.bf16 %v69_v36, %v69_v36  ;;  %v861_v38 = vld [vmem:[#allocation8 + $0x74] ss:$8 sps:$4 sm:$0xff]   ;;  %v863_v39 = vld [vmem:[#allocation8 + $0x70] ss:$8 sps:$4 sm:$0xff]   ;;  %v866_v41 = vld [vmem:[#allocation8 + $0x60] ss:$8 sps:$4 sm:$0xff]  }
  0x32   :  { %632 = vmatprep.subr.bf16.mxu1 %v861_v38  ;;  %v867_v42 = vld [vmem:[#allocation8 + $0x54] ss:$8 sps:$4 sm:$0xff]   ;;  %v869_v43 = vld [vmem:[#allocation8 + $0x50] ss:$8 sps:$4 sm:$0xff]   ;;  %v870_v44 = vld [vmem:[#allocation8 + $0x44] ss:$8 sps:$4 sm:$0xff]  }
  0x33   :  { %272 = vmatpush1.bf16.msra.mxu0 %v824_v9  ;;  %633 = vmatpush1.bf16.msra.mxu1 %v863_v39  ;;  %v872_v45 = vld [vmem:[#allocation8 + $0x40] ss:$8 sps:$4 sm:$0xff]   ;;  %v873_v46 = vld [vmem:[#allocation8 + $0x34] ss:$8 sps:$4 sm:$0xff]   ;;  %v875_v47 = vld [vmem:[#allocation8 + $0x30] ss:$8 sps:$4 sm:$0xff]  }
  0x34   :  { %273 = vmatprep.subr.bf16.mxu0 %v825_v10  ;;  %634 = vmatprep.subr.bf16.mxu1 %v864_v40  ;;  %v876_v48 = vld [vmem:[#allocation8 + $0x24] ss:$8 sps:$4 sm:$0xff]   ;;  %v878_v49 = vld [vmem:[#allocation8 + $0x20] ss:$8 sps:$4 sm:$0xff]   ;;  %v879_v50 = vld [vmem:[#allocation8 + $0x14] ss:$8 sps:$4 sm:$0xff]  }
  0x35   :  { %v910_v8 = vpop.eup %909  ;;  %v881_v51 = vld [vmem:[#allocation8 + $0x10] ss:$8 sps:$4 sm:$0xff]   ;;  %v882_v52 = vld [vmem:[#allocation8 + $0x4] ss:$8 sps:$4 sm:$0xff]   ;;  %v884_v53 = vld [vmem:[#allocation8] ss:$8 sps:$4 sm:$0xff]  }
  0x36   :  { %803 = vpush %v910_v8  ;;  %v885_v54 = vld [vmem:[#allocation8 + $0xf4] ss:$8 sps:$4 sm:$0xff]   ;;  %v887_v55 = vld [vmem:[#allocation8 + $0xf0] ss:$8 sps:$4 sm:$0xff]   ;;  %v888_v56 = vld [vmem:[#allocation8 + $0xe4] ss:$8 sps:$4 sm:$0xff]   ;;  %v308_v8 = vstv %s1090_s0 }
  0x37   :  { %274 = vmatpush1.bf16.msra.mxu0 %v827_v11  ;;  %635 = vmatpush1.bf16.msra.mxu1 %v866_v41  ;;  %v890_v57 = vld [vmem:[#allocation8 + $0xe0] ss:$8 sps:$4 sm:$0xff]   ;;  %v891_v58 = vld [vmem:[#allocation8 + $0xd4] ss:$8 sps:$4 sm:$0xff]   ;;  %v893_v59 = vld [vmem:[#allocation8 + $0xd0] ss:$8 sps:$4 sm:$0xff]  }
  0x38   :  { %275 = vmatprep.subr.bf16.mxu0 %v828_v12  ;;  %636 = vmatprep.subr.bf16.mxu1 %v867_v42  ;;  %v894_v60 = vld [vmem:[#allocation8 + $0xc4] ss:$8 sps:$4 sm:$0xff]   ;;  %v896_v61 = vld [vmem:[#allocation8 + $0xc0] ss:$8 sps:$4 sm:$0xff]   ;;  %v897_v62 = vld [vmem:[#allocation8 + $0xb4] ss:$8 sps:$4 sm:$0xff]  }
  0x39   :  { %v899_v63 = vld [vmem:[#allocation8 + $0xb0] ss:$8 sps:$4 sm:$0xff]   ;;  %v900_v0 = vld [vmem:[#allocation8 + $0xa4] ss:$8 sps:$4 sm:$0xff]   ;;  %v902_v1 = vld [vmem:[#allocation8 + $0xa0] ss:$8 sps:$4 sm:$0xff]  }
  0x3a   :  { %v903_v2 = vld [vmem:[#allocation8 + $0x94] ss:$8 sps:$4 sm:$0xff]   ;;  %v905_v3 = vld [vmem:[#allocation8 + $0x90] ss:$8 sps:$4 sm:$0xff]   ;;  %v906_v4 = vld [vmem:[#allocation8 + $0x84] ss:$8 sps:$4 sm:$0xff]  }
  0x3b   :  { %276 = vmatpush1.bf16.msra.mxu0 %v830_v13  ;;  %637 = vmatpush1.bf16.msra.mxu1 %v869_v43  ;;  %v908_v5 = vld [vmem:[#allocation8 + $0x80] ss:$8 sps:$4 sm:$0xff]   ;;  %v307_v7 = vshrl.u32 %v306_v6, 7  ;;  %v1010_v9 = vmov 0.0  }
  0x3c   :  { %277 = vmatprep.subr.bf16.mxu0 %v831_v14  ;;  %638 = vmatprep.subr.bf16.mxu1 %v870_v44 }
  0x3d   :  { %vm309_vm0 = vcmp.lt.s32.totalorder %v307_v7, %v308_v8 }
  0x3e   :  { %v770_v10 = vsel %vm309_vm0, 1.0, %v1010_v9 }
  0x3f   :  { %278 = vmatpush1.bf16.msra.mxu0 %v833_v15  ;;  %639 = vmatpush1.bf16.msra.mxu1 %v872_v45 }
  0x40   :  { %279 = vmatprep.subr.bf16.mxu0 %v834_v17  ;;  %640 = vmatprep.subr.bf16.mxu1 %v873_v46 }
  0x43   :  { %280 = vmatpush1.bf16.msra.mxu0 %v836_v19  ;;  %641 = vmatpush1.bf16.msra.mxu1 %v875_v47 }
  0x44   :  { %281 = vmatprep.subr.bf16.mxu0 %v837_v20  ;;  %642 = vmatprep.subr.bf16.mxu1 %v876_v48 }
  0x47   :  { %282 = vmatpush2.bf16.msra.mxu0 %v839_v21  ;;  %643 = vmatpush1.bf16.msra.mxu1 %v878_v49 }
  0x48   :  { %283 = vmatprep.subr.bf16.mxu0 %v840_v22  ;;  %644 = vmatprep.subr.bf16.mxu1 %v879_v50 }
  0x4b   :  { %284 = vmatpush2.bf16.msra.mxu0 %v842_v23  ;;  %645 = vmatpush1.bf16.msra.mxu1 %v881_v51 }
  0x4c   :  { %285 = vmatprep.subr.bf16.mxu0 %v843_v24  ;;  %646 = vmatprep.subr.bf16.mxu1 %v882_v52 }
  0x4f   :  { %286 = vmatpush2.bf16.msra.mxu0 %v845_v25  ;;  %647 = vmatpush1.bf16.msra.mxu1 %v884_v53 }
  0x50   :  { %287 = vmatprep.subr.bf16.mxu0 %v846_v26  ;;  %648 = vmatprep.subr.bf16.mxu1 %v885_v54  ;;  %v1011_v54 = vmov 1966171168  }
  0x53   :  { %288 = vmatpush2.bf16.msra.mxu0 %v848_v27  ;;  %649 = vmatpush2.bf16.msra.mxu1 %v887_v55  ;;  %v361_v55 = vunpack.c.l.s4 %v1011_v54 }
  0x54   :  { %289 = vmatprep.subr.bf16.mxu0 %v849_v28  ;;  %650 = vmatprep.subr.bf16.mxu1 %v888_v56 }
  0x55   :  { %v362_v56 = vunpack.c.0.s8 %v361_v55 }
  0x57   :  { %290 = vmatpush2.bf16.msra.mxu0 %v851_v29  ;;  %651 = vmatpush2.bf16.msra.mxu1 %v890_v57 }
  0x58   :  { %291 = vmatprep.subr.bf16.mxu0 %v852_v30  ;;  %652 = vmatprep.subr.bf16.mxu1 %v891_v58  ;;  %v365_v58 = vsub.s32 %v362_v56, %v307_v7 }
  0x5b   :  { %292 = vmatpush2.bf16.msra.mxu0 %v854_v31  ;;  %653 = vmatpush2.bf16.msra.mxu1 %v893_v59 }
  0x5c   :  { %293 = vmatprep.subr.bf16.mxu0 %v855_v32  ;;  %654 = vmatprep.subr.bf16.mxu1 %v894_v60 }
  0x5f   :  { %294 = vmatpush2.bf16.msra.mxu0 %v857_v33  ;;  %655 = vmatpush2.bf16.msra.mxu1 %v896_v61 }
  0x60   :  { %295 = vmatprep.subr.bf16.mxu0 %v858_v34  ;;  %656 = vmatprep.subr.bf16.mxu1 %v897_v62  ;;  %v352_v62 = vld [vmem:[%s1093_s3] sm:$0x3] }
  0x63   :  { %296 = vmatpush2.bf16.msra.mxu0 %v860_v35  ;;  %657 = vmatpush2.bf16.msra.mxu1 %v899_v63 }
  0x64   :  { %658 = vmatprep.subr.bf16.mxu1 %v900_v0  ;;  %v380_v0 = vsub.s32 0, %v307_v7 }
  0x66   :  { %298 = vmatmul.mubr.bf16.vlgmr.msra.gmra.mxu0 %v71_v37 }
  0x67   :  { %659 = vmatpush2.bf16.msra.mxu1 %v902_v1  ;;  %s804_s0 = spop %803  ;;  %v384_v1 = vsub.s32 1, %v307_v7 }
  0x68   :  { %660 = vmatprep.subr.bf16.mxu1 %v903_v2  ;;  %v329_v26 = vstv %s804_s0 }
  0x6b   :  { %661 = vmatpush2.bf16.msra.mxu1 %v905_v3 }
  0x6c   :  { %662 = vmatprep.subr.bf16.mxu1 %v906_v4 }
  0x6f   :  { %663 = vmatpush2.bf16.msra.mxu1 %v908_v5 }
 0x126   :  { %v1068_v11 = vpop.f32.mrf.mxu0 }
 0x127   :  { %v315_v12 = vmul.f32 %v770_v10, %v1068_v11 }
 0x128   :  { %v1071_v13 = vpop.f32.mrf.mxu0 }
 0x129   :  { %v317_v14 = vrot.slane %v315_v12, 4  ;;  %v316_v15 = vmul.f32 %v770_v10, %v1071_v13 }
 0x12a   :  { %v303_v16 = vpop.f32.mrf.mxu0 }
 0x12b   :  { %v318_v17 = vadd.f32 %v317_v14, %v315_v12  ;;  %v323_v18 = vrot.slane %v316_v15, 4 }
 0x12c   :  { %v304_v19 = vpop.f32.mrf.mxu0 }
 0x12d   :  { %v319_v20 = vrot.slane %v318_v17, 2  ;;  %v324_v21 = vadd.f32 %v323_v18, %v316_v15 }
 0x12f   :  { %v320_v22 = vadd.f32 %v319_v20, %v318_v17  ;;  %v325_v23 = vrot.slane %v324_v21, 2 }
 0x131   :  { %v326_v24 = vadd.f32 %v325_v23, %v324_v21  ;;  %v321_v25 = vrot.slane %v320_v22, 1 }
 0x133   :  { %v322_v27 = vadd.f32 %v321_v25, %v320_v22  ;;  %v327_v28 = vrot.slane %v326_v24, 1 }
 0x135   :  { %v328_v29 = vadd.f32 %v327_v28, %v326_v24  ;;  %v330_v30 = vmul.f32 %v329_v26, %v322_v27  ;;  %v460_v24 = vld [vmem:[%s1096_s6] sm:$0x3] }
 0x136   :  { %v465_v25 = vrot.slane %v460_v24, %v380_v0 }
 0x137   :  { %v331_v31 = vmul.f32 %v329_v26, %v328_v29  ;;  %v332_v32 = vsub.f32 %v1068_v11, %v330_v30 }
 0x139   :  { %v333_v33 = vsub.f32 %v1071_v13, %v331_v31  ;;  %v334_v34 = vmul.f32 %v770_v10, %v332_v32 }
 0x13b   :  { %v335_v35 = vmul.f32 %v770_v10, %v333_v33  ;;  %v336_v36 = vmul.f32 %v334_v34, %v334_v34  ;;  %v376_v10 = vld [vmem:[%s1094_s4] sm:$0x3]  ;;  %s1012_s4 = smov [#allocation9]  }
 0x13c   :  { %s728_s6 = sshll.u32 %s1012_s4, 4  ;;  %s729_s6 = int_to_ptr.vmem [resolvable:$true] %s728_s6 }
 0x13d   :  { %v337_v37 = vmul.f32 %v335_v35, %v335_v35  ;;  %v338_v38 = vrot.slane %v336_v36, 4  ;;  %s979_s25 = scalar_lea.vmem %s729_s6, 256  ;;  %p984_p2 = scmp.lt.s32.totalorder %s729_s6, %s729_s6 }
 0x13e   :  { %p980_p1 = scmp.ne.s32.totalorder %s729_s6, %s979_s25  ;;  %p985_p3 = scmp.lt.s32.totalorder %s979_s25, %s979_s25 }
 0x13f   :  { %v339_v39 = vadd.f32 %v338_v38, %v336_v36  ;;  %v344_v40 = vrot.slane %v337_v37, 4 }
 0x140   :  { %p986_p4 = por %p985_p3, %p984_p2 }
 0x141   :  { %v340_v41 = vrot.slane %v339_v39, 2  ;;  %v345_v42 = vadd.f32 %v344_v40, %v337_v37 }
 0x142   :  { %p987_p5 = pnand %p986_p4, %p980_p1 }
 0x143   :  { %v341_v43 = vadd.f32 %v340_v41, %v339_v39  ;;  %v346_v44 = vrot.slane %v345_v42, 2 }
 0x145   :  { %v342_v45 = vrot.slane %v341_v43, 1  ;;  %v347_v46 = vadd.f32 %v346_v44, %v345_v42 }
 0x147   :  { %v343_v47 = vadd.f32 %v342_v45, %v341_v43  ;;  %v348_v48 = vrot.slane %v347_v46, 1 }
 0x149   :  { %v349_v49 = vadd.f32 %v348_v48, %v347_v46  ;;  %v350_v50 = vmul.f32 %v343_v47, %v329_v26 }
 0x14b   :  { %v351_v51 = vmul.f32 %v349_v49, %v329_v26  ;;  %v353_v52 = vadd.f32 1e-05, %v350_v50  ;;  %v469_v26 = vrot.slane %v460_v24, %v384_v1 }
 0x14d   :  { %v354_v53 = vadd.f32 1e-05, %v351_v51  ;;  %911 = vrsqrt.f32 %v353_v52 }
 0x14f   :  { %913 = vrsqrt.f32 %v354_v53 }
 0x15a   :  { %v912_v57 = vpop.eup %911 }
 0x15c   :  { %v914_v59 = vpop.eup %913 }
 0x15d   :  { %v359_v60 = vcombine.low %v912_v57, %v914_v59 }
 0x15f   :  { %v366_v61 = vrot.slane %v359_v60, %v365_v58 }
 0x161   :  { %v373_v63 = vrot.slane %v366_v61, %v365_v58 }
 0x163   :  { %v375_v2 = vmul.f32 %v373_v63, %v352_v62 }
 0x165   :  { %v381_v3 = vrot.slane %v375_v2, %v380_v0  ;;  %v385_v4 = vrot.slane %v375_v2, %v384_v1 }
 0x167   :  { %v388_v5 = vmul.f32 %v381_v3, %v330_v30  ;;  %v389_v6 = vmul.f32 %v385_v4, %v331_v31  ;;  %v410_v15 = vmul.f32 %v385_v4, %v1071_v13  ;;  %v409_v17 = vmul.f32 %v381_v3, %v1068_v11 }
 0x169   :  { %v392_v8 = vcombine.low %v388_v5, %v389_v6 }
 0x16b   :  { %v399_v9 = vrot.slane %v392_v8, %v365_v58 }
 0x16d   :  { %v406_v12 = vrot.slane %v399_v9, %v365_v58 }
 0x16f   :  { %v408_v14 = vsub.f32 %v376_v10, %v406_v12 }
 0x171   :  { %v419_v16 = vrot.slane %v408_v14, %v384_v1  ;;  %v415_v18 = vrot.slane %v408_v14, %v380_v0 }
 0x173   :  { %v423_v7 = vadd.f32 %v419_v16, %v410_v15  ;;  %v422_v19 = vadd.f32 %v415_v18, %v409_v17 }
 0x175   :  { %v425_v20 = vmax.f32 %v423_v7, 0.0  ;;  %v424_v21 = vmax.f32 %v422_v19, 0.0 }
 0x177   :  { %v427_v22 = vpack.c.bf16 %v425_v20, %v425_v20  ;;  %v426_v23 = vpack.c.bf16 %v424_v21, %v424_v21 }
 0x179   :  { %664 = vmatprep.mubr.bf16.mxu1 %v427_v22 }
 0x17a   :  { %665 = vmatmul.mubr.bf16.vlgmr.msra.gmra.mxu1 %v426_v23 }
 0x23a   :  { %v666_v27 = vpop.f32.mrf.mxu1 }
 0x23b   :  { %v667_v13 = vadd.f32 %v666_v27, %v465_v25 }
 0x23c   :  { %v668_v28 = vpop.f32.mrf.mxu1 }
 0x23d   :  { %720 = vst [vmem:[#allocation9] sm:$0xff] %v667_v13  ;;  %v669_v11 = vadd.f32 %v668_v28, %v469_v26 }
 0x23e   :  { %v670_v29 = vpop.f32.mrf.mxu1 }
 0x23f   :  { %v676_v30 = vsub.f32 0.0, %v669_v11  ;;  %v674_v43 = vmax.f32 %v669_v11, 0.0 }
 0x240   :  { %v671_v31 = vpop.f32.mrf.mxu1 }
 0x241   :  { %v682_v32 = vand.u32 2147483647, %v676_v30  ;;  %vm678_vm2 = vcmp.ne.f32.partialorder %v676_v30, %v676_v30 }
 0x243   :  { %v684_v33 = vsub.f32 0.0, %v682_v32 }
 0x245   :  { %v687_v34 = vmul.f32 1.442695, %v684_v33 }
 0x247   :  { %915 = vpow2.f32 %v687_v34 }
 0x254   :  { %v916_v35 = vpop.eup %915 }
 0x255   :  { %v698_v36 = vadd.f32 1.0, %v916_v35  ;;  %v701_v37 = vmul.f32 -0.5, %v916_v35  ;;  %v704_v39 = vand.u32 2147483647, %v916_v35 }
 0x257   :  { %917 = vlog2.f32 %v698_v36  ;;  %v702_v38 = vadd.f32 1.0, %v701_v37  ;;  %vm705_vm1 = vcmp.lt.f32.partialorder %v704_v39, 0.0004427343 }
 0x259   :  { %v703_v42 = vmul.f32 %v916_v35, %v702_v38 }
 0x264   :  { %v918_v40 = vpop.eup %917 }
 0x265   :  { %v700_v41 = vmul.f32 0.6931472, %v918_v40 }
 0x267   :  { %v706_v44 = vsel %vm705_vm1, %v703_v42, %v700_v41 }
 0x268   :  { %v708_v45 = vadd.f32 %v706_v44, %v674_v43 }
 0x26a   :  { %v710_v46 = vsel %vm678_vm2, %v669_v11, %v708_v45 }
 0x26b   :  { %v712_v47 = vadd.f32 0.0001, %v710_v46 }
 0x26d   :  { %721 = vst [vmem:[#allocation9 + $0x8] sm:$0xff] %v712_v47 }
 0x26e   :  { %990 = shalt.err (!%p987_p5)
}
 0x26f   :  { %731 = dma.vmem_to_hbm [thread:$0]  %s729_s6, 256, %s1097_s7, [#allocation5]  }
 0x270   :  { %1003 = dma.done.wait [#allocation5], 256  }
 0x271   :  { %1004 = vsyncadd [#allocation5], 4294967040 }
 0x272   :  { %735 = vsyncpa [#allocation4], 1 }
 0x273   :  { %736 = vsyncpa [#allocation7], 1 }
 0x274   :  { %737 = vsyncpa [#allocation5], 1 }

</bundles_post_ra>
